<compile_context>
chip_gen: v7x
topology: tpu7x:2x2x1
jax: 0.10.0
libtpu: 0.0.40
codegen_flags: <defaults>
</compile_context>

<pallas_src>
import functools

import jax
import jax.numpy as jnp
from jax import lax
from jax.experimental import pallas as pl
from jax.experimental.pallas import tpu as pltpu


def _patchnce_kernel(q_ref, k_ref, o_ref, *, temp):
    # q_ref / k_ref block: (Bt, P, Dp);  o_ref block: (1, Bt, P)
    bt, P, _ = q_ref.shape

    # Fold 1/temp into q once (Bt*P*Dp multiplies) instead of scaling the
    # (P, P) logits afterwards; keep the operand dtype so bf16 inputs stay on
    # the bf16 MXU path.  Accumulation below is f32 regardless.
    inv_t = jnp.asarray(1.0 / temp, dtype=q_ref.dtype)
    qs = q_ref[...] * inv_t                                   # (Bt, P, Dp)
    k = k_ref[...]                                            # (Bt, P, Dp)

    # Scaled gram matrix (q_i . k_j) / temp; contraction on the last axis of
    # both operands (no explicit transpose of k), f32 MXU accumulation.
    gram = jnp.einsum("bpd,bqd->bpq", qs, k,
                      preferred_element_type=jnp.float32)     # (Bt, P, P)

    # Diagonal mask, built once per grid step and reused for l_pos and l_neg.
    row = lax.broadcasted_iota(jnp.int32, (P, P), 0)
    col = lax.broadcasted_iota(jnp.int32, (P, P), 1)
    diag = row == col                                         # (P, P)

    # Positive logit = diagonal of the (already 1/temp-scaled) gram matrix.
    logit_pos = jnp.sum(jnp.where(diag, gram, 0.0),
                        axis=-1, keepdims=True)               # (Bt, P, 1)
    # Negative logits = gram with the diagonal masked to -10/temp
    # (reference masks to -10.0 *before* dividing by temp).
    logit_neg = jnp.where(diag, jnp.float32(-10.0 / temp), gram)

    # Stable cross-entropy against class 0 of cat([pos, neg]):
    #   loss = logsumexp([pos, neg]) - pos
    m = jnp.maximum(jnp.max(logit_neg, axis=-1, keepdims=True), logit_pos)
    sum_exp = jnp.exp(logit_pos - m) + jnp.sum(jnp.exp(logit_neg - m),
                                               axis=-1, keepdims=True)
    loss = (m + jnp.log(sum_exp) - logit_pos)[..., 0]         # (Bt, P)

    # TODO(synk): for very large npatches (P in the thousands) on v7x's 64 MiB
    # VMEM, tile the key axis with an online logsumexp instead of holding the
    # full (P, P) gram matrix.
    o_ref[...] = loss[None].astype(o_ref.dtype)               # (1, Bt, P)


def _pick_block_batch(batch, P, Dp, itemsize, budget_bytes=4 << 20):
    """Batches per grid step: big enough to amortize per-step overhead,
    small enough for double-buffered VMEM, and keep >= 2 grid steps when
    possible so v7x's two TensorCores both get work."""
    per_b = 2 * P * Dp * itemsize + 4 * P * P   # q + k slab + f32 gram
    bt = max(1, min(batch, budget_bytes // max(per_b, 1)))
    if batch >= 2:
        bt = max(1, min(bt, batch // 2))
    while batch % bt:
        bt -= 1
    return bt


def patch_nce_loss(feat_q, feat_k, batch, temp=0.07):
    """Pallas implementation of PatchNCELoss.forward (reduction='none')."""
    N, D = feat_q.shape
    assert N % batch == 0
    P = N // batch  # npatches

    # Zero-pad the feature dim to a lane multiple so rows fill vregs and the
    # MXU contraction dim is aligned; zero columns do not change dot products.
    Dp = ((D + 127) // 128) * 128
    if Dp != D:
        feat_q = jnp.pad(feat_q, ((0, 0), (0, Dp - D)))
        feat_k = jnp.pad(feat_k, ((0, 0), (0, Dp - D)))

    q = feat_q.reshape(batch, P, Dp)
    k = feat_k.reshape(batch, P, Dp)

    bt = _pick_block_batch(batch, P, Dp, q.dtype.itemsize)
    nblk = batch // bt

    cost = pl.CostEstimate(
        flops=2 * batch * P * P * Dp + 6 * batch * P * P,
        transcendentals=batch * P * (P + 2),
        bytes_accessed=2 * batch * P * Dp * q.dtype.itemsize + batch * P * 4,
    )

    out = pl.pallas_call(
        functools.partial(_patchnce_kernel, temp=temp),
        out_shape=jax.ShapeDtypeStruct((nblk, bt, P), jnp.float32),
        grid=(nblk,),
        in_specs=[
            pl.BlockSpec((bt, P, Dp), lambda b: (b, 0, 0)),
            pl.BlockSpec((bt, P, Dp), lambda b: (b, 0, 0)),
        ],
        out_specs=pl.BlockSpec((1, bt, P), lambda b: (b, 0, 0)),
        compiler_params=pltpu.CompilerParams(
            dimension_semantics=("parallel",)),
        cost_estimate=cost,
    )(q, k)

    return out.reshape(N)


def _reference(feat_q, feat_k, batch, temp=0.07):
    """Pure-JAX reference mirroring the PyTorch forward."""
    N, D = feat_q.shape
    P = N // batch
    l_pos = jnp.sum(feat_q * feat_k, axis=1, keepdims=True)            # (N, 1)
    q = feat_q.reshape(batch, P, D)
    k = feat_k.reshape(batch, P, D)
    l_neg = jnp.einsum("bpd,bqd->bpq", q, k)                           # (B,P,P)
    eye = jnp.eye(P, dtype=bool)[None]
    l_neg = jnp.where(eye, -10.0, l_neg).reshape(N, P)
    out = jnp.concatenate([l_pos, l_neg], axis=1) / temp               # (N,P+1)
    lse = jax.scipy.special.logsumexp(out, axis=1)
    return lse - out[:, 0]


if __name__ == "__main__":
    BATCH = 2         # self.batch_size
    NPATCHES = 8
    DIM = 32
    N = BATCH * NPATCHES

    key = jax.random.PRNGKey(0)
    kq, kk = jax.random.split(key)
    feat_q = jax.random.normal(kq, (N, DIM), dtype=jnp.float32)
    feat_k = jax.random.normal(kk, (N, DIM), dtype=jnp.float32)

    loss = patch_nce_loss(feat_q, feat_k, batch=BATCH, temp=0.07)
    jax.block_until_ready(loss)

    ref = _reference(feat_q, feat_k, batch=BATCH, temp=0.07)
    assert loss.shape == (N,)
    assert jnp.allclose(loss, ref, atol=1e-4, rtol=1e-4)

    print("KERNEL_OK")
</pallas_src>

<mosaic_0001>
module attributes {stable_mosaic.version = 11 : i64} {
  func.func @_patchnce_kernel(%arg0: i32, %arg1: memref<1x8x128xf32, #tpu.memory_space<vmem>>, %arg2: memref<1x8x128xf32, #tpu.memory_space<vmem>>, %arg3: memref<1x1x8xf32, #tpu.memory_space<vmem>>) attributes {dimension_semantics = [#tpu.dimension_semantics<parallel>], iteration_bounds = array<i64: 2>, scalar_prefetch = 0 : i64, scratch_operands = 0 : i64, tpu.core_type = #tpu.core_type<tc>, window_params = [{transform_indices = @transform_0, window_bounds = array<i64: 1, 8, 128>}, {transform_indices = @transform_1, window_bounds = array<i64: 1, 8, 128>}, {transform_indices = @transform_2, window_bounds = array<i64: 1, 1, 8>}]} {
    %c0 = arith.constant 0 : index
    %c0_0 = arith.constant 0 : index
    %c0_1 = arith.constant 0 : index
    %0 = vector.load %arg1[%c0, %c0_0, %c0_1] : memref<1x8x128xf32, #tpu.memory_space<vmem>>, vector<1x8x128xf32>
    %cst = arith.constant 14.2857141 : f32
    %1 = vector.broadcast %cst : f32 to vector<1x8x128xf32>
    %2 = arith.mulf %0, %1 : vector<1x8x128xf32>
    %c0_2 = arith.constant 0 : index
    %c0_3 = arith.constant 0 : index
    %c0_4 = arith.constant 0 : index
    %3 = vector.load %arg2[%c0_2, %c0_3, %c0_4] : memref<1x8x128xf32, #tpu.memory_space<vmem>>, vector<1x8x128xf32>
    "tpu.trace_start"() <{level = 10 : i32, message = "bpd,bqd->bpq"}> : () -> ()
    %cst_5 = arith.constant dense<0.000000e+00> : vector<1x8x8xf32>
    %4 = tpu.matmul %2, %3, %cst_5 {dimension_numbers = #tpu.dot_dimension_numbers<[2], [2], [1], [1], [0, 0, 0, 1, 1, 1], [0], [0]>} : vector<1x8x128xf32>, vector<1x8x128xf32>, vector<1x8x8xf32> -> vector<1x8x8xf32>
    "tpu.trace_stop"() : () -> ()
    %5 = tpu.iota {dimensions = array<i32: 0>} : vector<8x8xi32>
    %6 = tpu.iota {dimensions = array<i32: 1>} : vector<8x8xi32>
    %7 = arith.cmpi eq, %5, %6 : vector<8x8xi32>
    %cst_6 = arith.constant 0.000000e+00 : f32
    %8 = vector.shape_cast %7 : vector<8x8xi1> to vector<1x8x8xi1>
    %9 = vector.broadcast %cst_6 : f32 to vector<1x8x8xf32>
    %10 = arith.select %8, %4, %9 : vector<1x8x8xi1>, vector<1x8x8xf32>
    %cst_7 = arith.constant dense<0.000000e+00> : vector<1x8xf32>
    %11 = vector.multi_reduction <add>, %10, %cst_7 [2] : vector<1x8x8xf32> to vector<1x8xf32>
    %12 = vector.shape_cast %11 : vector<1x8xf32> to vector<1x8x1xf32>
    %cst_8 = arith.constant -142.857147 : f32
    %13 = vector.shape_cast %7 : vector<8x8xi1> to vector<1x8x8xi1>
    %14 = vector.broadcast %cst_8 : f32 to vector<1x8x8xf32>
    %15 = arith.select %13, %14, %4 : vector<1x8x8xi1>, vector<1x8x8xf32>
    %cst_9 = arith.constant dense<0xFF800000> : vector<1x8xf32>
    %16 = vector.multi_reduction <maximumf>, %15, %cst_9 [2] : vector<1x8x8xf32> to vector<1x8xf32>
    %17 = vector.shape_cast %16 : vector<1x8xf32> to vector<1x8x1xf32>
    %18 = arith.maximumf %17, %12 : vector<1x8x1xf32>
    %19 = arith.subf %12, %18 : vector<1x8x1xf32>
    %20 = math.exp %19 : vector<1x8x1xf32>
    %21 = vector.broadcast %18 : vector<1x8x1xf32> to vector<1x8x8xf32>
    %22 = arith.subf %15, %21 : vector<1x8x8xf32>
    %23 = math.exp %22 : vector<1x8x8xf32>
    %cst_10 = arith.constant dense<0.000000e+00> : vector<1x8xf32>
    %24 = vector.multi_reduction <add>, %23, %cst_10 [2] : vector<1x8x8xf32> to vector<1x8xf32>
    %25 = vector.shape_cast %24 : vector<1x8xf32> to vector<1x8x1xf32>
    %26 = arith.addf %20, %25 : vector<1x8x1xf32>
    %27 = math.log %26 : vector<1x8x1xf32>
    %28 = arith.addf %18, %27 : vector<1x8x1xf32>
    %29 = arith.subf %28, %12 : vector<1x8x1xf32>
    %30 = vector.shape_cast %29 : vector<1x8x1xf32> to vector<1x8xf32>
    %31 = vector.shape_cast %30 : vector<1x8xf32> to vector<1x1x8xf32>
    %c0_11 = arith.constant 0 : index
    %c0_12 = arith.constant 0 : index
    %c0_13 = arith.constant 0 : index
    %32 = vector.load %arg3[%c0_11, %c0_12, %c0_13] : memref<1x1x8xf32, #tpu.memory_space<vmem>>, vector<1x1x8xf32>
    tpu.vector_store %arg3[%c0_11, %c0_12, %c0_13], %31 {strides = array<i32>} : memref<1x1x8xf32, #tpu.memory_space<vmem>>, vector<1x1x8xf32>,
    return
  }
  func.func @transform_0(%arg0: i32) -> (i32, i32, i32) {
    %c0_i32 = arith.constant 0 : i32
    %c0_i32_0 = arith.constant 0 : i32
    %c0_i32_1 = arith.constant 0 : i32
    return %arg0, %c0_i32, %c0_i32_0 : i32, i32, i32
  }
  func.func @transform_1(%arg0: i32) -> (i32, i32, i32) {
    %c0_i32 = arith.constant 0 : i32
    %c0_i32_0 = arith.constant 0 : i32
    %c0_i32_1 = arith.constant 0 : i32
    return %arg0, %c0_i32, %c0_i32_0 : i32, i32, i32
  }
  func.func @transform_2(%arg0: i32) -> (i32, i32, i32) {
    %c0_i32 = arith.constant 0 : i32
    %c0_i32_0 = arith.constant 0 : i32
    %c0_i32_1 = arith.constant 0 : i32
    return %arg0, %c0_i32, %c0_i32_0 : i32, i32, i32
  }
}

</mosaic_0001>

<bundles_post_ra>
// kernel: tpu_custom_call.1
= control target key start
LH: loop header
LB: loop body
LE: loop exit
PB: predicated region body
PF: predicated region fallthrough
CT: control target
= control target key end

     0   :  { %7 = vsyncpa [#allocation3], 0  ;;  %s851_s0 = inlined_call_operand.hbm [shape: f32[2,8,128], index: 0, kind: input, shape index: {}]   ;;  %s852_s1 = inlined_call_operand.hbm [shape: f32[2,8,128], index: 1, kind: input, shape index: {}]   ;;  %s853_s2 = inlined_call_operand.hbm [shape: f32[2,1,8], index: 2, kind: output, shape index: {}]  }
   0x1   :  { %9 = vsyncpa [#allocation3 + $0x1], 0 }
   0x2   :  { %10 = vsyncpa [#allocation6], 0 }
   0x3   :  { %12 = vsyncpa [#allocation6 + $0x1], 0 }
   0x4   :  { %13 = vsyncpa [#allocation4], 0 }
   0x5   :  { %15 = vsyncpa [#allocation4 + $0x1], 0  ;;  %s638_s9 = smov 0   ;;  %s640_s10 = smov 0  }
   0x6   :  { %s642_s11 = smov 0   ;;  %s644_s12 = smov 0  }
   0x7 LB: > { %s659_s13 = sadd.s32 4294967295, %s616_s12   ;;  %s407_s14 = sadd.s32 4294967294, %s616_s12   ;;  %s616_s12 = sphi %s644_s12, %s872_s12   ;;  %s612_s11 = sphi %s642_s11, %s871_s11   ;;  %s608_s10 = sphi %s640_s10, %s870_s10   ;;  %s604_s9 = sphi %s638_s9, %s869_s9  }
   0x8   : > { %s663_s15 = sadd.s32 1, %s616_s12   ;;  %s28_s16 = sadd.s32 1, %s612_s11 }
   0x9   : > { %s25_s17 = ssub.s32 %s616_s12, %s663_s15  ;;  %p35_p0 = scmp.ne.s32.totalorder %s612_s11, %s608_s10 }
   0xa   : > { %p26_p1 = scmp.eq.s32.totalorder %s25_s17, 0  ;;  %p36_p2 = scmp.eq.s32.totalorder %s616_s12, 0 }
   0xb   : > { %p41_p3 = scmp.ne.s32.totalorder %s608_s10, %s604_s9  ;;  %p42_p4 = scmp.eq.s32.totalorder %s659_s13, 0 }
   0xc   : > { %s675_s18 = scalar_select %p26_p1, %s612_s11, %s28_s16  }
   0xd   : > { %p677_p5 = por %p36_p2, %p35_p0  ;;  %p681_p6 = por %p42_p4, %p41_p3 }
   0xe   : > { %p91_p7 = scmp.eq.s32.totalorder %s659_s13, 1  ;;  %p97_p8 = scmp.eq.s32.totalorder %s407_s14, 1 }
   0xf   : > { %s857_s20 = scalar_select %p681_p6, 1, 0 }
  0x10   : > { %p444_p10 = scmp.lt.s32.totalorder %s616_s12, 2  ;;  %p688_p11 = por %p91_p7, %p35_p0 }
  0x11   : > { %p692_p12 = por %p97_p8, %p41_p3  ;;  %s697_s23 = sand.u32 1, %s612_s11  }
  0x12   : > { %s858_s21 = scalar_select %p688_p11, 1, 0 }
  0x13   : > { %s859_s22 = scalar_select %p692_p12, 1, 0 }
  0x14   : > { %s411_s24 = sshll.u32 %s616_s12, 7  ;;  %s410_s25 = sshll.u32 %s697_s23, 3 }
  0x15   : > { %s706_s28 = scalar_lea.hbm %s851_s0, %s411_s24  ;;  %s121_s29 = scalar_lea.vmem [#allocation2], %s410_s25 }
  0x16   : > { %s128_s30 = sshll.u32 %s121_s29, 4  ;;  %p712_p13 = pnand %p444_p10, %p677_p5  ;;  %s716_s30 = int_to_ptr.vmem [resolvable:$true] %s128_s30 }
  0x17   : > { %s118_s4 = scalar_lea.sflag [#allocation3], %s697_s23  ;;  %s486_s5 = scalar_lea.hbm %s706_s28, 128 }
  0x18   : > { %p487_p2 = scmp.ne.s32.totalorder %s706_s28, %s486_s5  ;;  %p488_p3 = pneg %p712_p13 }
  0x19   : > { %s491_s8 = scalar_lea.hbm %s851_s0, 256  ;;  %p492_p5 = scmp.lt.u32.totalorder %s706_s28, %s851_s0 }
  0x1a   : > { %p489_p4 = pnand %p488_p3, %p487_p2  ;;  %p493_p8 = scmp.lt.u32.totalorder %s491_s8, %s486_s5 }
  0x1b   : > { %p495_p9 = scmp.lt.u32.totalorder %s486_s5, %s706_s28 }
  0x1c   : > { %p490_p7 = pneg %p489_p4  ;;  %p494_p10 = por %p493_p8, %p492_p5 }
  0x1e   : > { %p496_p0 = por %p495_p9, %p494_p10 }
  0x20   : > { %p497_p1 = pnand %p496_p0, %p490_p7 }
  0x22   : > { %500 = shalt.err (!%p497_p1)
}
  0x23   : > { %s501_s17 = scalar_lea.vmem %s716_s30, 128  ;;  %s618_s19 = smov [#allocation2]  }
  0x24   : > { %p502_p2 = scmp.ne.s32.totalorder %s716_s30, %s501_s17  ;;  %s506_s26 = sshll.u32 %s618_s19, 4  ;;  %s507_s26 = int_to_ptr.vmem [resolvable:$false] %s506_s26 }
  0x25   : > { %s508_s27 = scalar_lea.vmem %s507_s26, 256  ;;  %p509_p11 = scmp.lt.s32.totalorder %s716_s30, %s507_s26 }
  0x26   : > { %p504_p4 = pnand %p502_p2, %p488_p3  ;;  %p510_p5 = scmp.lt.s32.totalorder %s508_s27, %s501_s17 }
  0x28   : > { %p505_p12 = pneg %p504_p4  ;;  %p511_p8 = por %p510_p5, %p509_p11 }
  0x2a   : > { %p512_p9 = pnand %p511_p8, %p505_p12 }
  0x2c   : > { %515 = shalt.err (!%p512_p9)
}
  0x2d   : > { %436 = dma.hbm_to_vmem [thread:$0]  (!%p712_p13), %s706_s28, 128, %s716_s30, %s118_s4  }
  0x2e   : > { %p861_p0 = scmp.lt.s32.totalorder %s616_s12, 3  ;;  %p862_p1 = scmp.ge.s32.totalorder %s616_s12, 1 }
  0x2f   : > { %s759_s7 = scalar_lea.hbm %s852_s1, %s411_s24  ;;  %s139_s8 = scalar_lea.vmem [#allocation5], %s410_s25 }
  0x30   : > { %p750_p7 = pnand %p862_p1, %p861_p0  ;;  %s146_s14 = sshll.u32 %s139_s8, 4  ;;  %s147_s14 = int_to_ptr.vmem [resolvable:$true] %s146_s14 }
  0x31   : > { %s136_s28 = scalar_lea.sflag [#allocation6], %s697_s23  ;;  %s516_s30 = scalar_lea.hbm %s759_s7, 128 }
  0x32   : > { %s863_s29 = scalar_select %p750_p7, 1, 0 }
  0x33   : > { %p517_p11 = scmp.ne.s32.totalorder %s759_s7, %s516_s30  ;;  %s521_s24 = scalar_lea.hbm %s852_s1, 256 }
  0x34   : > { %p522_p2 = scmp.lt.u32.totalorder %s759_s7, %s852_s1  ;;  %p523_p4 = scmp.lt.u32.totalorder %s521_s24, %s516_s30 }
  0x35   : > { %p519_p12 = pnand %p517_p11, %p488_p3  ;;  %p525_p8 = scmp.lt.u32.totalorder %s516_s30, %s759_s7 }
  0x36   : > { %p524_p5 = por %p523_p4, %p522_p2 }
  0x37   : > { %p520_p10 = pneg %p519_p12 }
  0x38   : > { %p526_p9 = por %p525_p8, %p524_p5 }
  0x3a   : > { %p527_p0 = pnand %p526_p9, %p520_p10 }
  0x3c   : > { %530 = shalt.err (!%p527_p0)
}
  0x3d   : > { %s531_s23 = scalar_lea.vmem %s147_s14, 128  ;;  %s619_s25 = smov [#allocation5]  }
  0x3e   : > { %p532_p1 = scmp.ne.s32.totalorder %s147_s14, %s531_s23  ;;  %s536_s26 = sshll.u32 %s619_s25, 4  ;;  %s537_s26 = int_to_ptr.vmem [resolvable:$false] %s536_s26 }
  0x3f   : > { %s538_s27 = scalar_lea.vmem %s537_s26, 256  ;;  %p539_p6 = scmp.lt.s32.totalorder %s147_s14, %s537_s26 }
  0x40   : > { %p534_p11 = pnand %p532_p1, %p488_p3  ;;  %p540_p7 = scmp.lt.s32.totalorder %s538_s27, %s531_s23 }
  0x42   : > { %p535_p12 = pneg %p534_p11  ;;  %p541_p2 = por %p540_p7, %p539_p6 }
  0x44   : > { %p542_p4 = pnand %p541_p2, %p535_p12 }
  0x46   : > { %545 = shalt.err (!%p542_p4)
}
  0x47   : > { %439 = dma.hbm_to_vmem [thread:$0]  (!%p712_p13), %s759_s7, 128, %s147_s14, %s136_s28  }
  0x48   : > { %p864_p10 = scmp.ne.s32.totalorder %s863_s29, 0 }
  0x49   : > { %s786_s5 = sand.u32 (!%p864_p10), 1, %s608_s10   ;;  %p865_p3 = scmp.ne.s32.totalorder (!%p864_p10), %s857_s20, 0 }
  0x4a   : > { %155 = sbr.rel (%p864_p10) target bundleno = 644 (0x284), region = 28  ;;  %s415_s6 = sshll.u32 (!%p864_p10), %s786_s5, 3 }
  0x4b   : > { %s158_s8 = scalar_lea.sflag (!%p864_p10), [#allocation3], %s786_s5  ;;  %s161_s30 = scalar_lea.vmem (!%p864_p10), [#allocation2], %s415_s6 }
  0x51   : > { %591 = dma.done.wait (%p865_p3), %s158_s8, 128  }
  0x52   : > { %593 = vsyncadd (%p865_p3), %s158_s8, 4294967168  ;;  %s167_s3 = scalar_lea.sflag [#allocation6], %s786_s5  ;;  %s170_s7 = scalar_lea.vmem [#allocation5], %s415_s6 }
  0x53   : > { %595 = dma.done.wait (%p865_p3), %s167_s3, 128  }
  0x54   : > { %597 = vsyncadd (%p865_p3), %s167_s3, 4294967168  ;;  %v620_v0 = vmov 0.0   ;;  %vm621_vm0 = vmmov 0   ;;  %v197_v1 = vld [vmem:[%s170_s7] sm:$0xff]  ;;  %v195_v2 = vld [vmem:[%s161_s30] sm:$0xff]  ;;  %v268_v4 = vlaneseq  ;;  %vm274_vm2 = vcmask 64512  }
  0x55   : > { %422 = vmatprep.subr.mxu0 %v620_v0  ;;  %424 = vmatprep.mubr.msk.f32.mxu0 %vm621_vm0, %v620_v0  ;;  %v196_v3 = vmul.f32 14.285714, %v195_v2  ;;  %s417_s20 = sshll.u32 %s659_s13, 4  ;;  %s194_s29 = scalar_lea.vmem [#allocation7], %s786_s5  ;;  %vm303_vm3 = vcmask 57344  }
  0x56   : > { %423 = vmatpush3.xpose.msra.mxu0 %v197_v1  ;;  %v269_v5 = vshrl.u32 %v268_v4, 7  ;;  %v271_v6 = vand.u32 127, %v268_v4  ;;  %s318_s14 = sshll.u32 %s194_s29, 4  ;;  %s807_s16 = scalar_lea.hbm %s853_s2, %s417_s20  ;;  %s809_s14 = int_to_ptr.vmem [resolvable:$true] %s318_s14 }
  0x57   : > { %s306_s24 = scalar_lea.sflag [#allocation4], %s786_s5  ;;  %s546_s17 = scalar_lea.vmem %s809_s14, 16 }
  0x58   : > { %v300_v7 = vsub.s32 %v271_v6, %v269_v5  ;;  %vm272_vm1 = vcmp.eq.s32.totalorder %v269_v5, %v271_v6  ;;  %p547_p6 = scmp.ne.s32.totalorder %s809_s14, %s546_s17  ;;  %p866_p13 = scmp.ne.s32.totalorder %s858_s21, 0 }
  0x59   : > { %425 = vmatmul.mubr.f32.vlgmr.msra.gmra.mrb[0].mxu0 %v196_v3  ;;  %s622_s13 = smov [#allocation7]  }
  0x5a   : > { %p548_p7 = pnand %p547_p6, %p866_p13  ;;  %s550_s19 = sshll.u32 %s622_s13, 4  ;;  %s551_s19 = int_to_ptr.vmem [resolvable:$false] %s550_s19 }
  0x5b   : > { %s552_s23 = scalar_lea.vmem %s551_s19, 32  ;;  %p553_p8 = scmp.lt.s32.totalorder %s809_s14, %s551_s19 }
  0x5c   : > { %p549_p5 = pneg %p548_p7  ;;  %p554_p9 = scmp.lt.s32.totalorder %s552_s23, %s546_s17 }
  0x5e   : > { %p555_p0 = por %p554_p9, %p553_p8 }
  0x60   : > { %p556_p1 = pnand %p555_p0, %p549_p5 }
 0x12c   : > { %v264_v8 = vpop.f32.mrb[0].mxu0 }
 0x12d   : > { %v426_v9 = vpop.f32.mrb[1].mxu0  ;;  %v273_v10 = vsel %vm272_vm1, %v264_v8, 0.0  ;;  %v278_v12 = vsel %vm272_vm1, -142.85715, %v264_v8 }
 0x12e   : > { %v275_v11 = vsel %vm274_vm2, %v273_v10, 0.0  ;;  %v279_v13 = vsel %vm274_vm2, %v278_v12, -inf }
 0x12f   : > { %276 = vadd.xlane.f32.xlu0 %v275_v11 }
 0x133   : > { %280 = vmax.xlane.f32.xlu0 %v279_v13 }
 0x1bc   : > { %v277_v14 = vpop.xlane.xlu0 %276 }
 0x1c0   : > { %v281_v15 = vpop.xlane.xlu0 %280 }
 0x1c1   : > { %v282_v16 = vmax.f32 %v281_v15, %v277_v14 }
 0x1c3   : > { %v286_v17 = vsub.f32 %v278_v12, %v282_v16  ;;  %v283_v21 = vsub.f32 %v277_v14, %v282_v16 }
 0x1c5   : > { %v287_v18 = vmul.f32 1.442695, %v286_v17  ;;  %v284_v22 = vmul.f32 1.442695, %v283_v21 }
 0x1c7   : > { %480 = vpow2.f32 %v287_v18 }
 0x1c8   : > { %482 = vpow2.f32 %v284_v22 }
 0x1d1   : > { %v481_v19 = vpop.eup %480 }
 0x1d2   : > { %v289_v20 = vsel %vm274_vm2, %v481_v19, 0.0  ;;  %v483_v23 = vpop.eup %482 }
 0x1d3   : > { %290 = vadd.xlane.f32.xlu1 %v289_v20 }
 0x260   : > { %v291_v24 = vpop.xlane.xlu1 %290 }
 0x261   : > { %v292_v25 = vadd.f32 %v483_v23, %v291_v24 }
 0x263   : > { %484 = vlog2.f32 %v292_v25 }
 0x26d   : > { %v485_v26 = vpop.eup %484 }
 0x26e   : > { %v294_v27 = vmul.f32 0.6931472, %v485_v26 }
 0x270   : > { %v295_v28 = vadd.f32 %v294_v27, %v282_v16 }
 0x272   : > { %v296_v29 = vsub.f32 %v295_v28, %v277_v14 }
 0x274   : > { %v301_v30 = vrot.slane %v296_v29, %v300_v7 }
 0x276   : > { %304 = vst.msk [vmem:[%s194_s29] sm:$0x1] %vm303_vm3, %v301_v30 }
 0x277   : > { %559 = shalt.err (!%p556_p1)
}
 0x278   : > { %s560_s25 = scalar_lea.hbm %s807_s16, 16  ;;  %s564_s5 = scalar_lea.hbm %s853_s2, 32 }
 0x279   : > { %p561_p11 = scmp.ne.s32.totalorder %s807_s16, %s560_s25  ;;  %p565_p4 = scmp.lt.u32.totalorder %s807_s16, %s853_s2 }
 0x27a   : > { %p566_p10 = scmp.lt.u32.totalorder %s564_s5, %s560_s25  ;;  %p568_p6 = scmp.lt.u32.totalorder %s560_s25, %s807_s16 }
 0x27b   : > { %p562_p12 = pnand %p561_p11, %p866_p13 }
 0x27c   : > { %p567_p3 = por %p566_p10, %p565_p4 }
 0x27d   : > { %p563_p2 = pneg %p562_p12 }
 0x27e   : > { %p569_p7 = por %p568_p6, %p567_p3 }
 0x280   : > { %p570_p5 = pnand %p569_p7, %p563_p2 }
 0x282   : > { %573 = shalt.err (!%p570_p5)
}
 0x283   : > { %431 = dma.vmem_to_hbm [thread:$0]  (%p866_p13), %s809_s14, 16, %s807_s16, %s306_s24  }
 0x284 PF: > { %s330_s30 = sand.u32 1, %s604_s9   ;;  %p867_p8 = scmp.ne.s32.totalorder %s859_s22, 0 }
 0x285   : > { %p868_p9 = scmp.ge.s32.totalorder %s616_s12, 2  ;;  %s331_s3 = scalar_lea.sflag [#allocation4], %s330_s30 }
 0x287   : > { %p441_p0 = pnand %p868_p9, %p867_p8 }
 0x289   : > { %599 = dma.done.wait (!%p441_p0), %s331_s3, 16  }
 0x28a   : > { %601 = vsyncadd (!%p441_p0), %s331_s3, 4294967280  ;;  %p18_p1 = scmp.ge.s32.totalorder %s663_s15, 4   ;;  %s869_s9 = smov %s608_s10 }
 0x28b   : > { %s870_s10 = smov %s612_s11  ;;  %s871_s11 = smov %s675_s18 }
 0x28c   : > { %s872_s12 = smov %s663_s15  ;;  %20 = sbr.rel (!%p18_p1) target bundleno = 7 (0x7), region = 86 }
 0x293   :  { %335 = vsyncpa [#allocation3], 1 }
 0x294   :  { %337 = vsyncpa [#allocation3 + $0x1], 1 }
 0x295   :  { %338 = vsyncpa [#allocation6], 1 }
 0x296   :  { %340 = vsyncpa [#allocation6 + $0x1], 1 }
 0x297   :  { %341 = vsyncpa [#allocation4], 1 }
 0x298   :  { %343 = vsyncpa [#allocation4 + $0x1], 1 }

</bundles_post_ra>
